<compile_context>
chip_gen: v7x
topology: tpu7x:2x2x1
jax: 0.10.0
libtpu: 0.0.40
codegen_flags: <defaults>
</compile_context>

<pallas_src>
import functools

import jax
import jax.numpy as jnp
from jax.experimental import pallas as pl
from jax.experimental.pallas import tpu as pltpu


def _round_up(v, m):
    return ((v + m - 1) // m) * m


def _vmem_bytes(Bt, N, C, Cp, itemsize):
    """Rough live-set estimate (bytes) for one grid step."""
    weights = (C * 3 * C + C * Cp + Cp) * itemsize       # single-buffered (Buffered(1))
    x_blk = 2 * Bt * N * C * itemsize                    # double-buffered input block
    o_blk = 2 * Bt * N * Cp * itemsize                   # double-buffered output block
    qkv_f32 = Bt * N * 3 * C * 4                         # fused QKV result (f32)
    logits = 2 * Bt * N * N * 4                          # per-head s + p (f32)
    ctx = Bt * N * C * 4                                  # context scratch accumulator
    proj = Bt * N * Cp * 4                                # projection result (f32)
    return weights + x_blk + o_blk + qkv_f32 + logits + ctx + proj


def _pick_block_b(B, N, C, Cp, itemsize, target_rows=1024, vmem_cap=48 << 20):
    """Largest divisor Bt of B fitting the row target and VMEM budget,
    preferring configurations with grid = B//Bt >= 2 (v7x megacore)."""
    divisors = [bt for bt in range(1, B + 1) if B % bt == 0]
    fitting = [bt for bt in divisors
               if bt * N <= max(target_rows, N)
               and _vmem_bytes(bt, N, C, Cp, itemsize) <= vmem_cap]
    if not fitting:
        fitting = [1]
    multi_core = [bt for bt in fitting if B // bt >= 2]
    return max(multi_core) if multi_core else max(fitting)


def attention_kernel(x_ref, wqkv_ref, wproj_ref, bproj_ref, o_ref, ctx_ref, *,
                     num_heads, scale):
    """One grid step processes Bt batch elements, full sequence.

    x_ref    : (Bt, N, C)   activations (native dtype)
    wqkv_ref : (C, 3C)      qkv weight with LoRA deltas pre-folded (wrapper)
    wproj_ref: (C, Cp)      output projection weight, lane-padded to Cp
    bproj_ref: (1, Cp)      output projection bias, lane-padded
    o_ref    : (Bt, N, Cp)  output (sliced back to C in the wrapper)
    ctx_ref  : (Bt*N, C)    f32 VMEM scratch: per-head context accumulator
    """
    Bt, N, C = x_ref.shape
    H = num_heads
    hd = C // H
    dt = x_ref.dtype
    # f32 softmax math for f32 inputs (and v5e, no bf16 VPU/EUP); bf16 exp +
    # approx reciprocal for bf16 inputs (EUP is the saturating slot on
    # v6e/v7x at small head dims).
    low_precision = jnp.dtype(dt) != jnp.dtype(jnp.float32)

    # Fused QKV projection over Bt*N rows. Operands stay in the input dtype;
    # f32 accumulation via preferred_element_type (MXU-native bf16 path).
    x2 = x_ref[...].reshape(Bt * N, C)
    qkv = jnp.dot(x2, wqkv_ref[...],
                  preferred_element_type=jnp.float32)            # (Bt*N, 3C) f32

    # Per-head attention, batched over the Bt block (3-D einsum, single leading
    # batch dim). Per-head tiles are sliced straight out of the f32 qkv result;
    # no full (Bt, N, C) q/k/v copies. attn_drop is Dropout(p=0.0) -> identity.
    for h in range(H):
        lo = h * hd
        qh = (qkv[:, lo:lo + hd] * scale).astype(dt).reshape(Bt, N, hd)
        kh = qkv[:, C + lo:C + lo + hd].astype(dt).reshape(Bt, N, hd)
        vh = qkv[:, 2 * C + lo:2 * C + lo + hd].astype(dt).reshape(Bt, N, hd)

        s = jnp.einsum("bqd,bkd->bqk", qh, kh,
                       preferred_element_type=jnp.float32)       # (Bt, N, N) f32
        s = s - jnp.max(s, axis=-1, keepdims=True)
        if low_precision:
            p = jnp.exp(s.astype(jnp.bfloat16))                  # bf16 EUP path
            denom = jnp.sum(p.astype(jnp.float32), axis=-1, keepdims=True)
            inv = pl.reciprocal(denom, approx=True)              # (Bt, N, 1)
        else:
            p = jnp.exp(s)
            denom = jnp.sum(p, axis=-1, keepdims=True)
            inv = pl.reciprocal(denom, approx=False)

        # PV matmul on unnormalized probabilities (fast MXU dtype);
        # normalization deferred to the small (Bt, N, hd) context, written into
        # the scratch accumulator at a static column offset (no concat).
        ctx_h = jnp.einsum("bqk,bkd->bqd", p.astype(dt), vh,
                           preferred_element_type=jnp.float32)   # (Bt, N, hd) f32
        ctx_ref[:, lo:lo + hd] = (ctx_h * inv).reshape(Bt * N, hd)

    # Output projection with bias (proj_drop(p=0.0) -> identity). Lane-dense
    # store: o_ref last dim is padded to a multiple of 128 by the wrapper.
    y = jnp.dot(ctx_ref[...].astype(dt), wproj_ref[...],
                preferred_element_type=jnp.float32)
    y = y + bproj_ref[...].astype(jnp.float32)
    o_ref[...] = y.reshape(Bt, N, -1).astype(o_ref.dtype)


@functools.partial(jax.jit, static_argnames=("num_heads", "block_b"))
def attention_forward(x, params, num_heads, block_b=None):
    B, N, C = x.shape
    assert C % num_heads == 0
    # Sublane alignment: the (Bt, N, C) -> (Bt*N, C) merge in the kernel is only
    # a free relayout when N is a multiple of 8.
    # TODO(synk): support ragged N via key-masked logits + padded queries.
    assert N % 8 == 0, "sequence length must be a multiple of 8 (sublane)"
    head_dim = C // num_heads
    scale = head_dim ** (-0.5)
    itemsize = jnp.dtype(x.dtype).itemsize

    # Fold the rank-r LoRA deltas into the qkv weight (forward-pass identity:
    # x@W + (x@A)@B == x@(W + A@B), up to rounding in the weight dtype).
    w_eff = params["w_qkv"]
    w_eff = w_eff.at[:, :C].add(
        jnp.dot(params["w_a_q"], params["w_b_q"]).astype(w_eff.dtype))
    w_eff = w_eff.at[:, 2 * C:].add(
        jnp.dot(params["w_a_v"], params["w_b_v"]).astype(w_eff.dtype))

    # Lane-pad the projection output channels to a multiple of 128 so the
    # kernel's output store is lane-dense; sliced back below.
    Cp = _round_up(C, 128)
    w_proj = params["w_proj"]
    b_proj = params["b_proj"]
    if Cp != C:
        w_proj = jnp.pad(w_proj, ((0, 0), (0, Cp - C)))
        b_proj = jnp.pad(b_proj, ((0, 0), (0, Cp - C)))

    Bt = block_b if block_b is not None else _pick_block_b(B, N, C, Cp, itemsize)
    assert B % Bt == 0

    # Explicit VMEM budget: weights single-buffered, x/o double-buffered,
    # f32 intermediates; clamped to [32 MiB, 64 MiB] (safe on all generations,
    # v7x physical VMEM is 64 MiB).
    vmem_limit = int(min(max(int(_vmem_bytes(Bt, N, C, Cp, itemsize) * 1.5),
                             32 << 20), 64 << 20))

    kernel = functools.partial(attention_kernel,
                               num_heads=num_heads, scale=scale)

    out = pl.pallas_call(
        kernel,
        out_shape=jax.ShapeDtypeStruct((B, N, Cp), x.dtype),
        grid_spec=pltpu.PrefetchScalarGridSpec(
            num_scalar_prefetch=0,
            grid=(B // Bt,),
            in_specs=[
                pl.BlockSpec((Bt, N, C), lambda b: (b, 0, 0)),     # x
                # Weights/bias have constant index_maps -> single-buffer them.
                pl.BlockSpec((C, 3 * C), lambda b: (0, 0),
                             pipeline_mode=pl.Buffered(1)),        # W_eff (qkv+LoRA)
                pl.BlockSpec((C, Cp), lambda b: (0, 0),
                             pipeline_mode=pl.Buffered(1)),        # W_proj (padded)
                pl.BlockSpec((1, Cp), lambda b: (0, 0),
                             pipeline_mode=pl.Buffered(1)),        # b_proj (padded)
            ],
            out_specs=pl.BlockSpec((Bt, N, Cp), lambda b: (b, 0, 0)),
            scratch_shapes=[pltpu.VMEM((Bt * N, C), jnp.float32)],
        ),
        compiler_params=pltpu.CompilerParams(
            dimension_semantics=("parallel",),
            vmem_limit_bytes=vmem_limit),
    )(x, w_eff, w_proj, b_proj)

    return out[..., :C] if Cp != C else out


def attention_reference(x, params, num_heads):
    """Pure-JAX reference mirroring the PyTorch forward exactly (unfused LoRA)."""
    B, N, C = x.shape
    head_dim = C // num_heads
    scale = head_dim ** (-0.5)

    qkv = x @ params["w_qkv"]                                    # (B, N, 3C)
    new_q = (x @ params["w_a_q"]) @ params["w_b_q"]
    new_v = (x @ params["w_a_v"]) @ params["w_b_v"]
    qkv = qkv.at[:, :, :C].add(new_q)
    qkv = qkv.at[:, :, -C:].add(new_v)

    qkv = qkv.reshape(B, N, 3, num_heads, head_dim).transpose(2, 0, 3, 1, 4)
    q, k, v = qkv[0], qkv[1], qkv[2]                             # (B, H, N, hd)
    attn = jnp.einsum("bhqd,bhkd->bhqk", q, k) * scale
    attn = jax.nn.softmax(attn, axis=-1)
    out = jnp.einsum("bhqk,bhkd->bhqd", attn, v)
    out = out.transpose(0, 2, 1, 3).reshape(B, N, C)
    return out @ params["w_proj"] + params["b_proj"][0]


def init_params(key, dim, num_heads, r=4, dtype=jnp.float32):
    ks = jax.random.split(key, 7)
    s = 0.05
    # All weights stored as (in_features, out_features), i.e. W^T of PyTorch.
    return {
        "w_qkv": (jax.random.normal(ks[0], (dim, 3 * dim)) * s).astype(dtype),
        "w_a_q": (jax.random.normal(ks[1], (dim, r)) * s).astype(dtype),
        "w_b_q": (jax.random.normal(ks[2], (r, dim)) * s).astype(dtype),
        "w_a_v": (jax.random.normal(ks[3], (dim, r)) * s).astype(dtype),
        "w_b_v": (jax.random.normal(ks[4], (r, dim)) * s).astype(dtype),
        "w_proj": (jax.random.normal(ks[5], (dim, dim)) * s).astype(dtype),
        "b_proj": (jax.random.normal(ks[6], (1, dim)) * s).astype(dtype),
    }


if __name__ == "__main__":
    B, N, DIM, HEADS = 2, 8, 32, 8

    key = jax.random.PRNGKey(0)
    k_x, k_p = jax.random.split(key)
    x = jax.random.normal(k_x, (B, N, DIM), dtype=jnp.float32)
    params = init_params(k_p, DIM, HEADS)

    out = attention_forward(x, params, HEADS)
    out = jax.block_until_ready(out)

    ref = attention_reference(x, params, HEADS)
    assert out.shape == (B, N, DIM)
    err = float(jnp.max(jnp.abs(out - ref)))
    assert jnp.allclose(out, ref, atol=1e-4, rtol=1e-4), err
    print("KERNEL_OK")
</pallas_src>

<mosaic_0001>
module attributes {stable_mosaic.version = 11 : i64} {
  func.func @attention_kernel(%arg0: i32, %arg1: memref<1x8x32xf32, #tpu.memory_space<vmem>>, %arg2: memref<32x96xf32, #tpu.memory_space<vmem>>, %arg3: memref<32x128xf32, #tpu.memory_space<vmem>>, %arg4: memref<1x128xf32, #tpu.memory_space<vmem>>, %arg5: memref<1x8x128xf32, #tpu.memory_space<vmem>>, %arg6: memref<8x32xf32, #tpu.memory_space<vmem>>) attributes {dimension_semantics = [#tpu.dimension_semantics<parallel>], iteration_bounds = array<i64: 2>, scalar_prefetch = 0 : i64, scratch_operands = 1 : i64, tpu.core_type = #tpu.core_type<tc>, window_params = [{transform_indices = @transform_0, window_bounds = array<i64: 1, 8, 32>}, {pipeline_mode = #tpu.pipeline_mode<synchronous>, transform_indices = @transform_1, window_bounds = array<i64: 32, 96>}, {pipeline_mode = #tpu.pipeline_mode<synchronous>, transform_indices = @transform_2, window_bounds = array<i64: 32, 128>}, {pipeline_mode = #tpu.pipeline_mode<synchronous>, transform_indices = @transform_3, window_bounds = array<i64: 1, 128>}, {transform_indices = @transform_4, window_bounds = array<i64: 1, 8, 128>}]} {
    %c0 = arith.constant 0 : index
    %c0_0 = arith.constant 0 : index
    %c0_1 = arith.constant 0 : index
    %0 = vector.load %arg1[%c0, %c0_0, %c0_1] : memref<1x8x32xf32, #tpu.memory_space<vmem>>, vector<1x8x32xf32>
    %1 = vector.shape_cast %0 : vector<1x8x32xf32> to vector<8x32xf32>
    %c0_2 = arith.constant 0 : index
    %c0_3 = arith.constant 0 : index
    %2 = vector.load %arg2[%c0_2, %c0_3] : memref<32x96xf32, #tpu.memory_space<vmem>>, vector<32x96xf32>
    %cst = arith.constant dense<0.000000e+00> : vector<8x96xf32>
    %3 = tpu.matmul %1, %2, %cst {dimension_numbers = #tpu.dot_dimension_numbers<[1], [0], [0], [1], [0, 0, 1, 1], [], []>} : vector<8x32xf32>, vector<32x96xf32>, vector<8x96xf32> -> vector<8x96xf32>
    %4 = vector.extract_strided_slice %3 {offsets = [0, 0], sizes = [8, 4], strides = [1, 1]} : vector<8x96xf32> to vector<8x4xf32>
    %cst_4 = arith.constant 5.000000e-01 : f32
    %5 = vector.broadcast %cst_4 : f32 to vector<8x4xf32>
    %6 = arith.mulf %4, %5 : vector<8x4xf32>
    %7 = vector.shape_cast %6 : vector<8x4xf32> to vector<1x8x4xf32>
    %8 = vector.extract_strided_slice %3 {offsets = [0, 32], sizes = [8, 4], strides = [1, 1]} : vector<8x96xf32> to vector<8x4xf32>
    %9 = vector.shape_cast %8 : vector<8x4xf32> to vector<1x8x4xf32>
    %10 = vector.extract_strided_slice %3 {offsets = [0, 64], sizes = [8, 4], strides = [1, 1]} : vector<8x96xf32> to vector<8x4xf32>
    %11 = vector.shape_cast %10 : vector<8x4xf32> to vector<1x8x4xf32>
    "tpu.trace_start"() <{level = 10 : i32, message = "bqd,bkd->bqk"}> : () -> ()
    %cst_5 = arith.constant dense<0.000000e+00> : vector<1x8x8xf32>
    %12 = tpu.matmul %7, %9, %cst_5 {dimension_numbers = #tpu.dot_dimension_numbers<[2], [2], [1], [1], [0, 0, 0, 1, 1, 1], [0], [0]>} : vector<1x8x4xf32>, vector<1x8x4xf32>, vector<1x8x8xf32> -> vector<1x8x8xf32>
    "tpu.trace_stop"() : () -> ()
    %cst_6 = arith.constant dense<0xFF800000> : vector<1x8xf32>
    %13 = vector.multi_reduction <maximumf>, %12, %cst_6 [2] : vector<1x8x8xf32> to vector<1x8xf32>
    %14 = vector.shape_cast %13 : vector<1x8xf32> to vector<1x8x1xf32>
    %15 = vector.broadcast %14 : vector<1x8x1xf32> to vector<1x8x8xf32>
    %16 = arith.subf %12, %15 : vector<1x8x8xf32>
    %17 = math.exp %16 : vector<1x8x8xf32>
    %cst_7 = arith.constant dense<0.000000e+00> : vector<1x8xf32>
    %18 = vector.multi_reduction <add>, %17, %cst_7 [2] : vector<1x8x8xf32> to vector<1x8xf32>
    %19 = vector.shape_cast %18 : vector<1x8xf32> to vector<1x8x1xf32>
    %20 = tpu.reciprocal %19 : vector<1x8x1xf32> -> vector<1x8x1xf32>
    "tpu.trace_start"() <{level = 10 : i32, message = "bqk,bkd->bqd"}> : () -> ()
    %cst_8 = arith.constant dense<0.000000e+00> : vector<1x8x4xf32>
    %21 = tpu.matmul %17, %11, %cst_8 {dimension_numbers = #tpu.dot_dimension_numbers<[2], [1], [1], [2], [0, 0, 0, 1, 1, 2], [0], [0]>} : vector<1x8x8xf32>, vector<1x8x4xf32>, vector<1x8x4xf32> -> vector<1x8x4xf32>
    "tpu.trace_stop"() : () -> ()
    %22 = vector.broadcast %20 : vector<1x8x1xf32> to vector<1x8x4xf32>
    %23 = arith.mulf %21, %22 : vector<1x8x4xf32>
    %24 = vector.shape_cast %23 : vector<1x8x4xf32> to vector<8x4xf32>
    %c0_9 = arith.constant 0 : index
    %c0_10 = arith.constant 0 : index
    %25 = vector.load %arg6[%c0_9, %c0_10] : memref<8x32xf32, #tpu.memory_space<vmem>>, vector<8x4xf32>
    tpu.vector_store %arg6[%c0_9, %c0_10], %24 {strides = array<i32>} : memref<8x32xf32, #tpu.memory_space<vmem>>, vector<8x4xf32>,
    %26 = vector.extract_strided_slice %3 {offsets = [0, 4], sizes = [8, 4], strides = [1, 1]} : vector<8x96xf32> to vector<8x4xf32>
    %cst_11 = arith.constant 5.000000e-01 : f32
    %27 = vector.broadcast %cst_11 : f32 to vector<8x4xf32>
    %28 = arith.mulf %26, %27 : vector<8x4xf32>
    %29 = vector.shape_cast %28 : vector<8x4xf32> to vector<1x8x4xf32>
    %30 = vector.extract_strided_slice %3 {offsets = [0, 36], sizes = [8, 4], strides = [1, 1]} : vector<8x96xf32> to vector<8x4xf32>
    %31 = vector.shape_cast %30 : vector<8x4xf32> to vector<1x8x4xf32>
    %32 = vector.extract_strided_slice %3 {offsets = [0, 68], sizes = [8, 4], strides = [1, 1]} : vector<8x96xf32> to vector<8x4xf32>
    %33 = vector.shape_cast %32 : vector<8x4xf32> to vector<1x8x4xf32>
    "tpu.trace_start"() <{level = 10 : i32, message = "bqd,bkd->bqk"}> : () -> ()
    %cst_12 = arith.constant dense<0.000000e+00> : vector<1x8x8xf32>
    %34 = tpu.matmul %29, %31, %cst_12 {dimension_numbers = #tpu.dot_dimension_numbers<[2], [2], [1], [1], [0, 0, 0, 1, 1, 1], [0], [0]>} : vector<1x8x4xf32>, vector<1x8x4xf32>, vector<1x8x8xf32> -> vector<1x8x8xf32>
    "tpu.trace_stop"() : () -> ()
    %cst_13 = arith.constant dense<0xFF800000> : vector<1x8xf32>
    %35 = vector.multi_reduction <maximumf>, %34, %cst_13 [2] : vector<1x8x8xf32> to vector<1x8xf32>
    %36 = vector.shape_cast %35 : vector<1x8xf32> to vector<1x8x1xf32>
    %37 = vector.broadcast %36 : vector<1x8x1xf32> to vector<1x8x8xf32>
    %38 = arith.subf %34, %37 : vector<1x8x8xf32>
    %39 = math.exp %38 : vector<1x8x8xf32>
    %cst_14 = arith.constant dense<0.000000e+00> : vector<1x8xf32>
    %40 = vector.multi_reduction <add>, %39, %cst_14 [2] : vector<1x8x8xf32> to vector<1x8xf32>
    %41 = vector.shape_cast %40 : vector<1x8xf32> to vector<1x8x1xf32>
    %42 = tpu.reciprocal %41 : vector<1x8x1xf32> -> vector<1x8x1xf32>
    "tpu.trace_start"() <{level = 10 : i32, message = "bqk,bkd->bqd"}> : () -> ()
    %cst_15 = arith.constant dense<0.000000e+00> : vector<1x8x4xf32>
    %43 = tpu.matmul %39, %33, %cst_15 {dimension_numbers = #tpu.dot_dimension_numbers<[2], [1], [1], [2], [0, 0, 0, 1, 1, 2], [0], [0]>} : vector<1x8x8xf32>, vector<1x8x4xf32>, vector<1x8x4xf32> -> vector<1x8x4xf32>
    "tpu.trace_stop"() : () -> ()
    %44 = vector.broadcast %42 : vector<1x8x1xf32> to vector<1x8x4xf32>
    %45 = arith.mulf %43, %44 : vector<1x8x4xf32>
    %46 = vector.shape_cast %45 : vector<1x8x4xf32> to vector<8x4xf32>
    %c0_16 = arith.constant 0 : index
    %c4 = arith.constant 4 : index
    %47 = vector.load %arg6[%c0_16, %c4] : memref<8x32xf32, #tpu.memory_space<vmem>>, vector<8x4xf32>
    tpu.vector_store %arg6[%c0_16, %c4], %46 {strides = array<i32>} : memref<8x32xf32, #tpu.memory_space<vmem>>, vector<8x4xf32>,
    %48 = vector.extract_strided_slice %3 {offsets = [0, 8], sizes = [8, 4], strides = [1, 1]} : vector<8x96xf32> to vector<8x4xf32>
    %cst_17 = arith.constant 5.000000e-01 : f32
    %49 = vector.broadcast %cst_17 : f32 to vector<8x4xf32>
    %50 = arith.mulf %48, %49 : vector<8x4xf32>
    %51 = vector.shape_cast %50 : vector<8x4xf32> to vector<1x8x4xf32>
    %52 = vector.extract_strided_slice %3 {offsets = [0, 40], sizes = [8, 4], strides = [1, 1]} : vector<8x96xf32> to vector<8x4xf32>
    %53 = vector.shape_cast %52 : vector<8x4xf32> to vector<1x8x4xf32>
    %54 = vector.extract_strided_slice %3 {offsets = [0, 72], sizes = [8, 4], strides = [1, 1]} : vector<8x96xf32> to vector<8x4xf32>
    %55 = vector.shape_cast %54 : vector<8x4xf32> to vector<1x8x4xf32>
    "tpu.trace_start"() <{level = 10 : i32, message = "bqd,bkd->bqk"}> : () -> ()
    %cst_18 = arith.constant dense<0.000000e+00> : vector<1x8x8xf32>
    %56 = tpu.matmul %51, %53, %cst_18 {dimension_numbers = #tpu.dot_dimension_numbers<[2], [2], [1], [1], [0, 0, 0, 1, 1, 1], [0], [0]>} : vector<1x8x4xf32>, vector<1x8x4xf32>, vector<1x8x8xf32> -> vector<1x8x8xf32>
    "tpu.trace_stop"() : () -> ()
    %cst_19 = arith.constant dense<0xFF800000> : vector<1x8xf32>
    %57 = vector.multi_reduction <maximumf>, %56, %cst_19 [2] : vector<1x8x8xf32> to vector<1x8xf32>
    %58 = vector.shape_cast %57 : vector<1x8xf32> to vector<1x8x1xf32>
    %59 = vector.broadcast %58 : vector<1x8x1xf32> to vector<1x8x8xf32>
    %60 = arith.subf %56, %59 : vector<1x8x8xf32>
    %61 = math.exp %60 : vector<1x8x8xf32>
    %cst_20 = arith.constant dense<0.000000e+00> : vector<1x8xf32>
    %62 = vector.multi_reduction <add>, %61, %cst_20 [2] : vector<1x8x8xf32> to vector<1x8xf32>
    %63 = vector.shape_cast %62 : vector<1x8xf32> to vector<1x8x1xf32>
    %64 = tpu.reciprocal %63 : vector<1x8x1xf32> -> vector<1x8x1xf32>
    "tpu.trace_start"() <{level = 10 : i32, message = "bqk,bkd->bqd"}> : () -> ()
    %cst_21 = arith.constant dense<0.000000e+00> : vector<1x8x4xf32>
    %65 = tpu.matmul %61, %55, %cst_21 {dimension_numbers = #tpu.dot_dimension_numbers<[2], [1], [1], [2], [0, 0, 0, 1, 1, 2], [0], [0]>} : vector<1x8x8xf32>, vector<1x8x4xf32>, vector<1x8x4xf32> -> vector<1x8x4xf32>
    "tpu.trace_stop"() : () -> ()
    %66 = vector.broadcast %64 : vector<1x8x1xf32> to vector<1x8x4xf32>
    %67 = arith.mulf %65, %66 : vector<1x8x4xf32>
    %68 = vector.shape_cast %67 : vector<1x8x4xf32> to vector<8x4xf32>
    %c0_22 = arith.constant 0 : index
    %c8 = arith.constant 8 : index
    %69 = vector.load %arg6[%c0_22, %c8] : memref<8x32xf32, #tpu.memory_space<vmem>>, vector<8x4xf32>
    tpu.vector_store %arg6[%c0_22, %c8], %68 {strides = array<i32>} : memref<8x32xf32, #tpu.memory_space<vmem>>, vector<8x4xf32>,
    %70 = vector.extract_strided_slice %3 {offsets = [0, 12], sizes = [8, 4], strides = [1, 1]} : vector<8x96xf32> to vector<8x4xf32>
    %cst_23 = arith.constant 5.000000e-01 : f32
    %71 = vector.broadcast %cst_23 : f32 to vector<8x4xf32>
    %72 = arith.mulf %70, %71 : vector<8x4xf32>
    %73 = vector.shape_cast %72 : vector<8x4xf32> to vector<1x8x4xf32>
    %74 = vector.extract_strided_slice %3 {offsets = [0, 44], sizes = [8, 4], strides = [1, 1]} : vector<8x96xf32> to vector<8x4xf32>
    %75 = vector.shape_cast %74 : vector<8x4xf32> to vector<1x8x4xf32>
    %76 = vector.extract_strided_slice %3 {offsets = [0, 76], sizes = [8, 4], strides = [1, 1]} : vector<8x96xf32> to vector<8x4xf32>
    %77 = vector.shape_cast %76 : vector<8x4xf32> to vector<1x8x4xf32>
    "tpu.trace_start"() <{level = 10 : i32, message = "bqd,bkd->bqk"}> : () -> ()
    %cst_24 = arith.constant dense<0.000000e+00> : vector<1x8x8xf32>
    %78 = tpu.matmul %73, %75, %cst_24 {dimension_numbers = #tpu.dot_dimension_numbers<[2], [2], [1], [1], [0, 0, 0, 1, 1, 1], [0], [0]>} : vector<1x8x4xf32>, vector<1x8x4xf32>, vector<1x8x8xf32> -> vector<1x8x8xf32>
    "tpu.trace_stop"() : () -> ()
    %cst_25 = arith.constant dense<0xFF800000> : vector<1x8xf32>
    %79 = vector.multi_reduction <maximumf>, %78, %cst_25 [2] : vector<1x8x8xf32> to vector<1x8xf32>
    %80 = vector.shape_cast %79 : vector<1x8xf32> to vector<1x8x1xf32>
    %81 = vector.broadcast %80 : vector<1x8x1xf32> to vector<1x8x8xf32>
    %82 = arith.subf %78, %81 : vector<1x8x8xf32>
    %83 = math.exp %82 : vector<1x8x8xf32>
    %cst_26 = arith.constant dense<0.000000e+00> : vector<1x8xf32>
    %84 = vector.multi_reduction <add>, %83, %cst_26 [2] : vector<1x8x8xf32> to vector<1x8xf32>
    %85 = vector.shape_cast %84 : vector<1x8xf32> to vector<1x8x1xf32>
    %86 = tpu.reciprocal %85 : vector<1x8x1xf32> -> vector<1x8x1xf32>
    "tpu.trace_start"() <{level = 10 : i32, message = "bqk,bkd->bqd"}> : () -> ()
    %cst_27 = arith.constant dense<0.000000e+00> : vector<1x8x4xf32>
    %87 = tpu.matmul %83, %77, %cst_27 {dimension_numbers = #tpu.dot_dimension_numbers<[2], [1], [1], [2], [0, 0, 0, 1, 1, 2], [0], [0]>} : vector<1x8x8xf32>, vector<1x8x4xf32>, vector<1x8x4xf32> -> vector<1x8x4xf32>
    "tpu.trace_stop"() : () -> ()
    %88 = vector.broadcast %86 : vector<1x8x1xf32> to vector<1x8x4xf32>
    %89 = arith.mulf %87, %88 : vector<1x8x4xf32>
    %90 = vector.shape_cast %89 : vector<1x8x4xf32> to vector<8x4xf32>
    %c0_28 = arith.constant 0 : index
    %c12 = arith.constant 12 : index
    %91 = vector.load %arg6[%c0_28, %c12] : memref<8x32xf32, #tpu.memory_space<vmem>>, vector<8x4xf32>
    tpu.vector_store %arg6[%c0_28, %c12], %90 {strides = array<i32>} : memref<8x32xf32, #tpu.memory_space<vmem>>, vector<8x4xf32>,
    %92 = vector.extract_strided_slice %3 {offsets = [0, 16], sizes = [8, 4], strides = [1, 1]} : vector<8x96xf32> to vector<8x4xf32>
    %cst_29 = arith.constant 5.000000e-01 : f32
    %93 = vector.broadcast %cst_29 : f32 to vector<8x4xf32>
    %94 = arith.mulf %92, %93 : vector<8x4xf32>
    %95 = vector.shape_cast %94 : vector<8x4xf32> to vector<1x8x4xf32>
    %96 = vector.extract_strided_slice %3 {offsets = [0, 48], sizes = [8, 4], strides = [1, 1]} : vector<8x96xf32> to vector<8x4xf32>
    %97 = vector.shape_cast %96 : vector<8x4xf32> to vector<1x8x4xf32>
    %98 = vector.extract_strided_slice %3 {offsets = [0, 80], sizes = [8, 4], strides = [1, 1]} : vector<8x96xf32> to vector<8x4xf32>
    %99 = vector.shape_cast %98 : vector<8x4xf32> to vector<1x8x4xf32>
    "tpu.trace_start"() <{level = 10 : i32, message = "bqd,bkd->bqk"}> : () -> ()
    %cst_30 = arith.constant dense<0.000000e+00> : vector<1x8x8xf32>
    %100 = tpu.matmul %95, %97, %cst_30 {dimension_numbers = #tpu.dot_dimension_numbers<[2], [2], [1], [1], [0, 0, 0, 1, 1, 1], [0], [0]>} : vector<1x8x4xf32>, vector<1x8x4xf32>, vector<1x8x8xf32> -> vector<1x8x8xf32>
    "tpu.trace_stop"() : () -> ()
    %cst_31 = arith.constant dense<0xFF800000> : vector<1x8xf32>
    %101 = vector.multi_reduction <maximumf>, %100, %cst_31 [2] : vector<1x8x8xf32> to vector<1x8xf32>
    %102 = vector.shape_cast %101 : vector<1x8xf32> to vector<1x8x1xf32>
    %103 = vector.broadcast %102 : vector<1x8x1xf32> to vector<1x8x8xf32>
    %104 = arith.subf %100, %103 : vector<1x8x8xf32>
    %105 = math.exp %104 : vector<1x8x8xf32>
    %cst_32 = arith.constant dense<0.000000e+00> : vector<1x8xf32>
    %106 = vector.multi_reduction <add>, %105, %cst_32 [2] : vector<1x8x8xf32> to vector<1x8xf32>
    %107 = vector.shape_cast %106 : vector<1x8xf32> to vector<1x8x1xf32>
    %108 = tpu.reciprocal %107 : vector<1x8x1xf32> -> vector<1x8x1xf32>
    "tpu.trace_start"() <{level = 10 : i32, message = "bqk,bkd->bqd"}> : () -> ()
    %cst_33 = arith.constant dense<0.000000e+00> : vector<1x8x4xf32>
    %109 = tpu.matmul %105, %99, %cst_33 {dimension_numbers = #tpu.dot_dimension_numbers<[2], [1], [1], [2], [0, 0, 0, 1, 1, 2], [0], [0]>} : vector<1x8x8xf32>, vector<1x8x4xf32>, vector<1x8x4xf32> -> vector<1x8x4xf32>
    "tpu.trace_stop"() : () -> ()
    %110 = vector.broadcast %108 : vector<1x8x1xf32> to vector<1x8x4xf32>
    %111 = arith.mulf %109, %110 : vector<1x8x4xf32>
    %112 = vector.shape_cast %111 : vector<1x8x4xf32> to vector<8x4xf32>
    %c0_34 = arith.constant 0 : index
    %c16 = arith.constant 16 : index
    %113 = vector.load %arg6[%c0_34, %c16] : memref<8x32xf32, #tpu.memory_space<vmem>>, vector<8x4xf32>
    tpu.vector_store %arg6[%c0_34, %c16], %112 {strides = array<i32>} : memref<8x32xf32, #tpu.memory_space<vmem>>, vector<8x4xf32>,
    %114 = vector.extract_strided_slice %3 {offsets = [0, 20], sizes = [8, 4], strides = [1, 1]} : vector<8x96xf32> to vector<8x4xf32>
    %cst_35 = arith.constant 5.000000e-01 : f32
    %115 = vector.broadcast %cst_35 : f32 to vector<8x4xf32>
    %116 = arith.mulf %114, %115 : vector<8x4xf32>
    %117 = vector.shape_cast %116 : vector<8x4xf32> to vector<1x8x4xf32>
    %118 = vector.extract_strided_slice %3 {offsets = [0, 52], sizes = [8, 4], strides = [1, 1]} : vector<8x96xf32> to vector<8x4xf32>
    %119 = vector.shape_cast %118 : vector<8x4xf32> to vector<1x8x4xf32>
    %120 = vector.extract_strided_slice %3 {offsets = [0, 84], sizes = [8, 4], strides = [1, 1]} : vector<8x96xf32> to vector<8x4xf32>
    %121 = vector.shape_cast %120 : vector<8x4xf32> to vector<1x8x4xf32>
    "tpu.trace_start"() <{level = 10 : i32, message = "bqd,bkd->bqk"}> : () -> ()
    %cst_36 = arith.constant dense<0.000000e+00> : vector<1x8x8xf32>
    %122 = tpu.matmul %117, %119, %cst_36 {dimension_numbers = #tpu.dot_dimension_numbers<[2], [2], [1], [1], [0, 0, 0, 1, 1, 1], [0], [0]>} : vector<1x8x4xf32>, vector<1x8x4xf32>, vector<1x8x8xf32> -> vector<1x8x8xf32>
    "tpu.trace_stop"() : () -> ()
    %cst_37 = arith.constant dense<0xFF800000> : vector<1x8xf32>
    %123 = vector.multi_reduction <maximumf>, %122, %cst_37 [2] : vector<1x8x8xf32> to vector<1x8xf32>
    %124 = vector.shape_cast %123 : vector<1x8xf32> to vector<1x8x1xf32>
    %125 = vector.broadcast %124 : vector<1x8x1xf32> to vector<1x8x8xf32>
    %126 = arith.subf %122, %125 : vector<1x8x8xf32>
    %127 = math.exp %126 : vector<1x8x8xf32>
    %cst_38 = arith.constant dense<0.000000e+00> : vector<1x8xf32>
    %128 = vector.multi_reduction <add>, %127, %cst_38 [2] : vector<1x8x8xf32> to vector<1x8xf32>
    %129 = vector.shape_cast %128 : vector<1x8xf32> to vector<1x8x1xf32>
    %130 = tpu.reciprocal %129 : vector<1x8x1xf32> -> vector<1x8x1xf32>
    "tpu.trace_start"() <{level = 10 : i32, message = "bqk,bkd->bqd"}> : () -> ()
    %cst_39 = arith.constant dense<0.000000e+00> : vector<1x8x4xf32>
    %131 = tpu.matmul %127, %121, %cst_39 {dimension_numbers = #tpu.dot_dimension_numbers<[2], [1], [1], [2], [0, 0, 0, 1, 1, 2], [0], [0]>} : vector<1x8x8xf32>, vector<1x8x4xf32>, vector<1x8x4xf32> -> vector<1x8x4xf32>
    "tpu.trace_stop"() : () -> ()
    %132 = vector.broadcast %130 : vector<1x8x1xf32> to vector<1x8x4xf32>
    %133 = arith.mulf %131, %132 : vector<1x8x4xf32>
    %134 = vector.shape_cast %133 : vector<1x8x4xf32> to vector<8x4xf32>
    %c0_40 = arith.constant 0 : index
    %c20 = arith.constant 20 : index
    %135 = vector.load %arg6[%c0_40, %c20] : memref<8x32xf32, #tpu.memory_space<vmem>>, vector<8x4xf32>
    tpu.vector_store %arg6[%c0_40, %c20], %134 {strides = array<i32>} : memref<8x32xf32, #tpu.memory_space<vmem>>, vector<8x4xf32>,
    %136 = vector.extract_strided_slice %3 {offsets = [0, 24], sizes = [8, 4], strides = [1, 1]} : vector<8x96xf32> to vector<8x4xf32>
    %cst_41 = arith.constant 5.000000e-01 : f32
    %137 = vector.broadcast %cst_41 : f32 to vector<8x4xf32>
    %138 = arith.mulf %136, %137 : vector<8x4xf32>
    %139 = vector.shape_cast %138 : vector<8x4xf32> to vector<1x8x4xf32>
    %140 = vector.extract_strided_slice %3 {offsets = [0, 56], sizes = [8, 4], strides = [1, 1]} : vector<8x96xf32> to vector<8x4xf32>
    %141 = vector.shape_cast %140 : vector<8x4xf32> to vector<1x8x4xf32>
    %142 = vector.extract_strided_slice %3 {offsets = [0, 88], sizes = [8, 4], strides = [1, 1]} : vector<8x96xf32> to vector<8x4xf32>
    %143 = vector.shape_cast %142 : vector<8x4xf32> to vector<1x8x4xf32>
    "tpu.trace_start"() <{level = 10 : i32, message = "bqd,bkd->bqk"}> : () -> ()
    %cst_42 = arith.constant dense<0.000000e+00> : vector<1x8x8xf32>
    %144 = tpu.matmul %139, %141, %cst_42 {dimension_numbers = #tpu.dot_dimension_numbers<[2], [2], [1], [1], [0, 0, 0, 1, 1, 1], [0], [0]>} : vector<1x8x4xf32>, vector<1x8x4xf32>, vector<1x8x8xf32> -> vector<1x8x8xf32>
    "tpu.trace_stop"() : () -> ()
    %cst_43 = arith.constant dense<0xFF800000> : vector<1x8xf32>
    %145 = vector.multi_reduction <maximumf>, %144, %cst_43 [2] : vector<1x8x8xf32> to vector<1x8xf32>
    %146 = vector.shape_cast %145 : vector<1x8xf32> to vector<1x8x1xf32>
    %147 = vector.broadcast %146 : vector<1x8x1xf32> to vector<1x8x8xf32>
    %148 = arith.subf %144, %147 : vector<1x8x8xf32>
    %149 = math.exp %148 : vector<1x8x8xf32>
    %cst_44 = arith.constant dense<0.000000e+00> : vector<1x8xf32>
    %150 = vector.multi_reduction <add>, %149, %cst_44 [2] : vector<1x8x8xf32> to vector<1x8xf32>
    %151 = vector.shape_cast %150 : vector<1x8xf32> to vector<1x8x1xf32>
    %152 = tpu.reciprocal %151 : vector<1x8x1xf32> -> vector<1x8x1xf32>
    "tpu.trace_start"() <{level = 10 : i32, message = "bqk,bkd->bqd"}> : () -> ()
    %cst_45 = arith.constant dense<0.000000e+00> : vector<1x8x4xf32>
    %153 = tpu.matmul %149, %143, %cst_45 {dimension_numbers = #tpu.dot_dimension_numbers<[2], [1], [1], [2], [0, 0, 0, 1, 1, 2], [0], [0]>} : vector<1x8x8xf32>, vector<1x8x4xf32>, vector<1x8x4xf32> -> vector<1x8x4xf32>
    "tpu.trace_stop"() : () -> ()
    %154 = vector.broadcast %152 : vector<1x8x1xf32> to vector<1x8x4xf32>
    %155 = arith.mulf %153, %154 : vector<1x8x4xf32>
    %156 = vector.shape_cast %155 : vector<1x8x4xf32> to vector<8x4xf32>
    %c0_46 = arith.constant 0 : index
    %c24 = arith.constant 24 : index
    %157 = vector.load %arg6[%c0_46, %c24] : memref<8x32xf32, #tpu.memory_space<vmem>>, vector<8x4xf32>
    tpu.vector_store %arg6[%c0_46, %c24], %156 {strides = array<i32>} : memref<8x32xf32, #tpu.memory_space<vmem>>, vector<8x4xf32>,
    %158 = vector.extract_strided_slice %3 {offsets = [0, 28], sizes = [8, 4], strides = [1, 1]} : vector<8x96xf32> to vector<8x4xf32>
    %cst_47 = arith.constant 5.000000e-01 : f32
    %159 = vector.broadcast %cst_47 : f32 to vector<8x4xf32>
    %160 = arith.mulf %158, %159 : vector<8x4xf32>
    %161 = vector.shape_cast %160 : vector<8x4xf32> to vector<1x8x4xf32>
    %162 = vector.extract_strided_slice %3 {offsets = [0, 60], sizes = [8, 4], strides = [1, 1]} : vector<8x96xf32> to vector<8x4xf32>
    %163 = vector.shape_cast %162 : vector<8x4xf32> to vector<1x8x4xf32>
    %164 = vector.extract_strided_slice %3 {offsets = [0, 92], sizes = [8, 4], strides = [1, 1]} : vector<8x96xf32> to vector<8x4xf32>
    %165 = vector.shape_cast %164 : vector<8x4xf32> to vector<1x8x4xf32>
    "tpu.trace_start"() <{level = 10 : i32, message = "bqd,bkd->bqk"}> : () -> ()
    %cst_48 = arith.constant dense<0.000000e+00> : vector<1x8x8xf32>
    %166 = tpu.matmul %161, %163, %cst_48 {dimension_numbers = #tpu.dot_dimension_numbers<[2], [2], [1], [1], [0, 0, 0, 1, 1, 1], [0], [0]>} : vector<1x8x4xf32>, vector<1x8x4xf32>, vector<1x8x8xf32> -> vector<1x8x8xf32>
    "tpu.trace_stop"() : () -> ()
    %cst_49 = arith.constant dense<0xFF800000> : vector<1x8xf32>
    %167 = vector.multi_reduction <maximumf>, %166, %cst_49 [2] : vector<1x8x8xf32> to vector<1x8xf32>
    %168 = vector.shape_cast %167 : vector<1x8xf32> to vector<1x8x1xf32>
    %169 = vector.broadcast %168 : vector<1x8x1xf32> to vector<1x8x8xf32>
    %170 = arith.subf %166, %169 : vector<1x8x8xf32>
    %171 = math.exp %170 : vector<1x8x8xf32>
    %cst_50 = arith.constant dense<0.000000e+00> : vector<1x8xf32>
    %172 = vector.multi_reduction <add>, %171, %cst_50 [2] : vector<1x8x8xf32> to vector<1x8xf32>
    %173 = vector.shape_cast %172 : vector<1x8xf32> to vector<1x8x1xf32>
    %174 = tpu.reciprocal %173 : vector<1x8x1xf32> -> vector<1x8x1xf32>
    "tpu.trace_start"() <{level = 10 : i32, message = "bqk,bkd->bqd"}> : () -> ()
    %cst_51 = arith.constant dense<0.000000e+00> : vector<1x8x4xf32>
    %175 = tpu.matmul %171, %165, %cst_51 {dimension_numbers = #tpu.dot_dimension_numbers<[2], [1], [1], [2], [0, 0, 0, 1, 1, 2], [0], [0]>} : vector<1x8x8xf32>, vector<1x8x4xf32>, vector<1x8x4xf32> -> vector<1x8x4xf32>
    "tpu.trace_stop"() : () -> ()
    %176 = vector.broadcast %174 : vector<1x8x1xf32> to vector<1x8x4xf32>
    %177 = arith.mulf %175, %176 : vector<1x8x4xf32>
    %178 = vector.shape_cast %177 : vector<1x8x4xf32> to vector<8x4xf32>
    %c0_52 = arith.constant 0 : index
    %c28 = arith.constant 28 : index
    %179 = vector.load %arg6[%c0_52, %c28] : memref<8x32xf32, #tpu.memory_space<vmem>>, vector<8x4xf32>
    tpu.vector_store %arg6[%c0_52, %c28], %178 {strides = array<i32>} : memref<8x32xf32, #tpu.memory_space<vmem>>, vector<8x4xf32>,
    %c0_53 = arith.constant 0 : index
    %c0_54 = arith.constant 0 : index
    %180 = vector.load %arg6[%c0_53, %c0_54] : memref<8x32xf32, #tpu.memory_space<vmem>>, vector<8x32xf32>
    %c0_55 = arith.constant 0 : index
    %c0_56 = arith.constant 0 : index
    %181 = vector.load %arg3[%c0_55, %c0_56] : memref<32x128xf32, #tpu.memory_space<vmem>>, vector<32x128xf32>
    %cst_57 = arith.constant dense<0.000000e+00> : vector<8x128xf32>
    %182 = tpu.matmul %180, %181, %cst_57 {dimension_numbers = #tpu.dot_dimension_numbers<[1], [0], [0], [1], [0, 0, 1, 1], [], []>} : vector<8x32xf32>, vector<32x128xf32>, vector<8x128xf32> -> vector<8x128xf32>
    %c0_58 = arith.constant 0 : index
    %c0_59 = arith.constant 0 : index
    %183 = vector.load %arg4[%c0_58, %c0_59] : memref<1x128xf32, #tpu.memory_space<vmem>>, vector<1x128xf32>
    %184 = vector.broadcast %183 : vector<1x128xf32> to vector<8x128xf32>
    %185 = arith.addf %182, %184 : vector<8x128xf32>
    %186 = vector.shape_cast %185 : vector<8x128xf32> to vector<1x8x128xf32>
    %c0_60 = arith.constant 0 : index
    %c0_61 = arith.constant 0 : index
    %c0_62 = arith.constant 0 : index
    %187 = vector.load %arg5[%c0_60, %c0_61, %c0_62] : memref<1x8x128xf32, #tpu.memory_space<vmem>>, vector<1x8x128xf32>
    tpu.vector_store %arg5[%c0_60, %c0_61, %c0_62], %186 {strides = array<i32>} : memref<1x8x128xf32, #tpu.memory_space<vmem>>, vector<1x8x128xf32>,
    return
  }
  func.func @transform_0(%arg0: i32) -> (i32, i32, i32) {
    %c0_i32 = arith.constant 0 : i32
    %c0_i32_0 = arith.constant 0 : i32
    %c0_i32_1 = arith.constant 0 : i32
    return %arg0, %c0_i32, %c0_i32_0 : i32, i32, i32
  }
  func.func @transform_1(%arg0: i32) -> (i32, i32) {
    %c0_i32 = arith.constant 0 : i32
    %c0_i32_0 = arith.constant 0 : i32
    %c0_i32_1 = arith.constant 0 : i32
    return %c0_i32, %c0_i32_0 : i32, i32
  }
  func.func @transform_2(%arg0: i32) -> (i32, i32) {
    %c0_i32 = arith.constant 0 : i32
    %c0_i32_0 = arith.constant 0 : i32
    %c0_i32_1 = arith.constant 0 : i32
    return %c0_i32, %c0_i32_0 : i32, i32
  }
  func.func @transform_3(%arg0: i32) -> (i32, i32) {
    %c0_i32 = arith.constant 0 : i32
    %c0_i32_0 = arith.constant 0 : i32
    %c0_i32_1 = arith.constant 0 : i32
    return %c0_i32, %c0_i32_0 : i32, i32
  }
  func.func @transform_4(%arg0: i32) -> (i32, i32, i32) {
    %c0_i32 = arith.constant 0 : i32
    %c0_i32_0 = arith.constant 0 : i32
    %c0_i32_1 = arith.constant 0 : i32
    return %arg0, %c0_i32, %c0_i32_0 : i32, i32, i32
  }
}

</mosaic_0001>

<bundles_post_ra>
// kernel: attention_forward.1
= control target key start
LH: loop header
LB: loop body
LE: loop exit
PB: predicated region body
PF: predicated region fallthrough
CT: control target
= control target key end

     0   :  { %9 = vsyncpa [#allocation4], 0  ;;  %s2487_s0 = inlined_call_operand.vmem [shape: f32[2,8,32], index: 0, kind: input, shape index: {}]   ;;  %s2488_s1 = inlined_call_operand.vmem [shape: f32[32,96], index: 1, kind: input, shape index: {}]   ;;  %s2489_s2 = inlined_call_operand.vmem [shape: f32[32,128], index: 2, kind: input, shape index: {}]   ;;  %s2490_s3 = inlined_call_operand.vmem [shape: f32[1,128], index: 3, kind: input, shape index: {}]   ;;  %s2491_s4 = inlined_call_operand.hbm [shape: f32[2,8,128], index: 4, kind: output, shape index: {}]  }
   0x1   :  { %11 = vsyncpa [#allocation4 + $0x1], 0  ;;  %s2217_s15 = smov 0   ;;  %s2219_s16 = smov 0  }
   0x2   :  { %s2221_s17 = smov 0   ;;  %s2223_s18 = smov 0  }
   0x3 LB: > { %s2238_s19 = sadd.s32 4294967295, %s2156_s18   ;;  %s1797_s20 = sadd.s32 4294967294, %s2156_s18   ;;  %s2156_s18 = sphi %s2223_s18, %s2497_s18   ;;  %s2152_s17 = sphi %s2221_s17, %s2496_s17   ;;  %s2148_s16 = sphi %s2219_s16, %s2495_s16   ;;  %s2144_s15 = sphi %s2217_s15, %s2494_s15  }
   0x4   : > { %s2242_s21 = sadd.s32 1, %s2156_s18   ;;  %s113_s22 = sadd.s32 1, %s2152_s17 }
   0x5   : > { %s110_s23 = ssub.s32 %s2156_s18, %s2242_s21  ;;  %p123_p0 = scmp.ne.s32.totalorder %s2152_s17, %s2148_s16 }
   0x6   : > { %p111_p1 = scmp.eq.s32.totalorder %s110_s23, 0  ;;  %p124_p2 = scmp.eq.s32.totalorder %s2238_s19, 1 }
   0x7   : > { %p129_p3 = scmp.ne.s32.totalorder %s2148_s16, %s2144_s15  ;;  %p130_p4 = scmp.eq.s32.totalorder %s1797_s20, 1 }
   0x8   : > { %s2253_s24 = scalar_select %p111_p1, %s2152_s17, %s113_s22  }
   0x9   : > { %p2255_p5 = por %p124_p2, %p123_p0  ;;  %p2259_p6 = por %p130_p4, %p129_p3 }
   0xa   : > { %p1800_p7 = scmp.ge.s32.totalorder %s2156_s18, 1  ;;  %p164_p8 = scmp.lt.s32.totalorder %s2156_s18, 3 }
   0xc   : > { %p165_p9 = pnand %p1800_p7, %p164_p8 }
   0xd   : > { %v194_v0 = vld [vmem:[%s2488_s1] sm:$0xff] (!%p165_p9)  ;;  %v195_v1 = vld [vmem:[%s2488_s1 + $0x8] sm:$0xff] (!%p165_p9)  ;;  %v196_v2 = vld [vmem:[%s2488_s1 + $0x10] sm:$0xff] (!%p165_p9)  ;;  %v2158_v3 = vmov (!%p165_p9), 0.0|0.0   ;;  %vm2159_vm0 = vmmov (!%p165_p9), 0   ;;  %v2160_v6 = vmov (!%p165_p9), 0.0  }
   0xe   : > { %168 = sbr.rel (%p165_p9) target bundleno = 1689 (0x699), region = 36  ;;  %1978 = vmatprep.subr.bf16.mxu0 (!%p165_p9), %v2158_v3  ;;  %v1979_v4 = vpack.c.bf16 (!%p165_p9), %v195_v1, %v194_v0  ;;  %v197_v5 = vld [vmem:[%s2488_s1 + $0x18] sm:$0xff] (!%p165_p9)  ;;  %1884 = vmatprep.mubr.msk.f32.mxu0 (!%p165_p9), %vm2159_vm0, %v2160_v6  ;;  %p189_p10 = scmp.lt.s32.totalorder (!%p165_p9), %s2238_s19, 1  ;;  %vm198_vm1 = vcmask (!%p165_p9), 261120   ;;  %vm276_vm2 = vcmask (!%p165_p9), 31744   ;;  %vm352_vm3 = vcmask (!%p165_p9), 64512  }
   0xf   : > { %1887 = vmatprep.subr.mxu1 (!%p165_p9), %v2160_v6  ;;  %1889 = vmatprep.mubr.msk.f32.mxu1 (!%p165_p9), %vm2159_vm0, %v2160_v6  ;;  %v1982_v7 = vpack.c.bf16 (!%p165_p9), %v197_v5, %v196_v2  ;;  %s2161_s14 = smov (!%p165_p9), 64   ;;  %s2162_s20 = smov (!%p165_p9), 96   ;;  %vm610_vm4 = vcmask (!%p165_p9), 64544   ;;  %vm781_vm5 = vcmask (!%p165_p9), 97344   ;;  %vm952_vm6 = vcmask (!%p165_p9), 130144  }
  0x10   : > { %1980 = vmatpush3.bf16.msra.mxu0 (!%p165_p9), %v1979_v4  ;;  %s2163_s22 = smov (!%p165_p9), 92   ;;  %s2164_s23 = smov (!%p165_p9), 124   ;;  %vm1123_vm7 = vcmask (!%p165_p9), 162944   ;;  %vm1294_vm8 = vcmask (!%p165_p9), 195744   ;;  %vm1465_vm9 = vcmask (!%p165_p9), 228544   ;;  %vm1636_vm10 = vcmask (!%p165_p9), 261344  }
  0x11   : > { %1981 = vmatprep.subr.bf16.mxu0 (!%p165_p9), %v2158_v3  ;;  %s2165_s27 = smov (!%p165_p9), 88   ;;  %s2166_s28 = smov (!%p165_p9), 120  }
  0x12   : > { %s2167_s29 = smov (!%p165_p9), 84   ;;  %s2168_s30 = smov (!%p165_p9), 116  }
  0x13   : > { %s2169_s5 = smov (!%p165_p9), 80   ;;  %s2170_s6 = smov (!%p165_p9), 112  }
  0x14   : > { %1983 = vmatpush3.bf16.msra.mxu0 (!%p165_p9), %v1982_v7  ;;  %s2171_s7 = smov (!%p165_p9), 108   ;;  %s2172_s8 = smov (!%p165_p9), 72  }
  0x15   : > { %s190_s9 = scalar_select %p189_p10, %s2238_s19, 1  ;;  %1907 = vmatprep.subr.mxu0 %v2160_v6 }
  0x16   : > { %s2175_s11 = smov 100   ;;  %s2176_s12 = smov 56  }
  0x17   : > { %s1802_s10 = sshll.u32 %s190_s9, 3  ;;  %s2173_s9 = smov 104  }
  0x18   : > { %s192_s13 = scalar_lea.vmem %s2487_s0, %s1802_s10  ;;  %s2174_s10 = smov 68  }
  0x19   : > { %v193_v8 = vld [vmem:[%s192_s13] sm:$0xff]  ;;  %s2177_s13 = smov 76  }
  0x1a   : > { %1885 = vmatmul.mubr.msk.f32.vlgmr.msra.gmra.mrb[0].mxu0 %vm198_vm1, %v193_v8 }
  0x1b   : > { %1909 = vmatprep.mubr.msk.f32.mxu0 %vm2159_vm0, %v2160_v6 }
  0xed   : > { %v2293_v9 = vpop.f32.mrb[0].mxu0 }
  0xee   : > { %363 = vrot.lane.b32.xlu1 %v2293_v9, %s2161_s14  ;;  %274 = vrot.lane.b32.xlu0 %v2293_v9, %s2162_s20  ;;  %v1886_v10 = vpop.f32.mrb[1].mxu0  ;;  %v272_v11 = vmul.f32 0.5, %v2293_v9  ;;  %s2178_s14 = smov 60   ;;  %s2179_s20 = smov 44  }
  0xf2   : > { %443 = vrot.lane.b32.xlu1 %v2293_v9, %s2163_s22  ;;  %s2180_s22 = smov 52  }
  0xf6   : > { %441 = vrot.lane.b32.xlu1 %v272_v11, %s2164_s23  ;;  %s2181_s23 = smov 36  }
  0xfa   : > { %614 = vrot.lane.b32.xlu1 %v2293_v9, %s2165_s27  ;;  %s2182_s27 = smov 48  }
  0xfe   : > { %612 = vrot.lane.b32.xlu1 %v272_v11, %s2166_s28  ;;  %s2183_s28 = smov 40  }
 0x102   : > { %785 = vrot.lane.b32.xlu1 %v2293_v9, %s2167_s29  ;;  %s2184_s29 = smov 4  }
 0x106   : > { %783 = vrot.lane.b32.xlu1 %v272_v11, %s2168_s30  ;;  %s2185_s30 = smov 8  }
 0x10a   : > { %956 = vrot.lane.b32.xlu1 %v2293_v9, %s2169_s5  ;;  %s2186_s5 = smov 12  }
 0x10e   : > { %954 = vrot.lane.b32.xlu1 %v272_v11, %s2170_s6 }
 0x112   : > { %1125 = vrot.lane.b32.xlu1 %v272_v11, %s2171_s7 }
 0x116   : > { %1298 = vrot.lane.b32.xlu1 %v2293_v9, %s2172_s8 }
 0x11a   : > { %1296 = vrot.lane.b32.xlu1 %v272_v11, %s2173_s9 }
 0x11e   : > { %1469 = vrot.lane.b32.xlu1 %v2293_v9, %s2174_s10 }
 0x122   : > { %1467 = vrot.lane.b32.xlu1 %v272_v11, %s2175_s11 }
 0x126   : > { %700 = vrot.lane.b32.xlu1 %v2293_v9, %s2176_s12 }
 0x160   : > { %v364_v12 = vpop.permute.xlu1 %363  ;;  %v275_v13 = vpop.permute.xlu0 %274 }
 0x161   : > { %1888 = vmatpush3.xpose.msk.msra.mxu1 %vm276_vm2, %v275_v13 }
 0x162   : > { %1892 = vmatprep.subr.mxu1 %v2160_v6 }
 0x164   : > { %v2307_v14 = vpop.permute.xlu1 %443  ;;  %1890 = vmatmul.mubr.msk.f32.vlgmr.msra.gmra.mrb[0].mxu1 %vm276_vm2, %v272_v11 }
 0x165   : > { %1893 = vmatpush3.msra.mxu1 %v364_v12  ;;  %1894 = vmatprep.mubr.msk.f32.mxu1 %vm2159_vm0, %v2160_v6 }
 0x166   : > { %1897 = vmatprep.subr.mxu1 %v2160_v6 }
 0x168   : > { %v2313_v15 = vpop.permute.xlu1 %441 }
 0x16c   : > { %v615_v16 = vpop.permute.xlu1 %614 }
 0x16d   : > { %1908 = vmatpush3.xpose.msk.msra.mxu0 %vm276_vm2, %v615_v16 }
 0x16e   : > { %1917 = vmatprep.subr.mxu0 %v2160_v6 }
 0x170   : > { %v613_v17 = vpop.permute.xlu1 %612 }
 0x171   : > { %1910 = vmatmul.mubr.msk.f32.vlgmr.msra.gmra.mrb[2].mxu0 %vm276_vm2, %v613_v17 }
 0x172   : > { %1919 = vmatprep.mubr.msk.f32.mxu0 %vm2159_vm0, %v2160_v6 }
 0x174   : > { %v786_v18 = vpop.permute.xlu1 %785 }
 0x175   : > { %1918 = vmatpush3.xpose.msk.msra.mxu0 %vm276_vm2, %v786_v18 }
 0x176   : > { %1927 = vmatprep.subr.mxu0 %v2160_v6 }
 0x178   : > { %v784_v19 = vpop.permute.xlu1 %783 }
 0x179   : > { %1920 = vmatmul.mubr.msk.f32.vlgmr.msra.gmra.mrb[4].mxu0 %vm276_vm2, %v784_v19 }
 0x17a   : > { %1929 = vmatprep.mubr.msk.f32.mxu0 %vm2159_vm0, %v2160_v6 }
 0x17c   : > { %v957_v20 = vpop.permute.xlu1 %956 }
 0x17d   : > { %1928 = vmatpush3.xpose.msk.msra.mxu0 %vm276_vm2, %v957_v20 }
 0x17e   : > { %1937 = vmatprep.subr.mxu0 %v2160_v6 }
 0x180   : > { %v955_v21 = vpop.permute.xlu1 %954 }
 0x181   : > { %1930 = vmatmul.mubr.msk.f32.vlgmr.msra.gmra.mrb[6].mxu0 %vm276_vm2, %v955_v21 }
 0x182   : > { %1939 = vmatprep.mubr.msk.f32.mxu0 %vm2159_vm0, %v2160_v6 }
 0x184   : > { %v1126_v34 = vpop.permute.xlu1 %1125 }
 0x188   : > { %v1299_v35 = vpop.permute.xlu1 %1298 }
 0x18c   : > { %v1297_v38 = vpop.permute.xlu1 %1296 }
 0x190   : > { %v1470_v41 = vpop.permute.xlu1 %1469 }
 0x194   : > { %v1468_v43 = vpop.permute.xlu1 %1467 }
 0x198   : > { %v701_v12 = vpop.permute.xlu1 %700 }
 0x237   : > { %v348_v22 = vpop.f32.mrb[0].mxu1 }
 0x238   : > { %v1891_v23 = vpop.f32.mrb[1].mxu1  ;;  %v353_v24 = vsel %vm352_vm3, %v348_v22, -inf }
 0x239   : > { %354 = vmax.xlane.f32.xlu0 %v353_v24 }
 0x244   : > { %v2331_v25 = vpop.f32.mrb[2].mxu0 }
 0x245   : > { %v1911_v26 = vpop.f32.mrb[3].mxu0  ;;  %v690_v31 = vsel %vm352_vm3, %v2331_v25, -inf }
 0x24c   : > { %v2333_v27 = vpop.f32.mrb[4].mxu0 }
 0x24d   : > { %v1921_v28 = vpop.f32.mrb[5].mxu0  ;;  %v861_v32 = vsel %vm352_vm3, %v2333_v27, -inf }
 0x24f   : > { %1127 = vrot.lane.b32.xlu0 %v2293_v9, %s2177_s13 }
 0x253   : > { %529 = vrot.lane.b32.xlu0 %v2293_v9, %s2178_s14  ;;  %s2187_s14 = smov 16  }
 0x254   : > { %v2337_v29 = vpop.f32.mrb[6].mxu0 }
 0x255   : > { %v1931_v30 = vpop.f32.mrb[7].mxu0  ;;  %v1032_v33 = vsel %vm352_vm3, %v2337_v29, -inf }
 0x272   : > { %691 = vmax.xlane.f32.xlu0 %v690_v31 }
 0x276   : > { %862 = vmax.xlane.f32.xlu0 %v861_v32 }
 0x27a   : > { %1033 = vmax.xlane.f32.xlu0 %v1032_v33 }
 0x2c6   : > { %v355_v36 = vpop.xlane.xlu0 %354 }
 0x2c7   : > { %v356_v37 = vsub.f32 %v348_v22, %v355_v36 }
 0x2c9   : > { %v357_v39 = vmul.f32 1.442695, %v356_v37 }
 0x2ca   : > { %v1128_v40 = vpop.permute.xlu0 %1127 }
 0x2cb   : > { %2062 = vpow2.f32 %v357_v39  ;;  %1938 = vmatpush3.xpose.msk.msra.mxu0 %vm276_vm2, %v1128_v40 }
 0x2cc   : > { %1947 = vmatprep.subr.mxu0 %v2160_v6 }
 0x2ce   : > { %1940 = vmatmul.mubr.msk.f32.vlgmr.msra.gmra.mrb[8].mxu0 %vm276_vm2, %v1126_v34  ;;  %v530_v44 = vpop.permute.xlu0 %529 }
 0x2cf   : > { %1948 = vmatpush3.xpose.msk.msra.mxu0 %vm276_vm2, %v1299_v35  ;;  %1949 = vmatprep.mubr.msk.f32.mxu0 %vm2159_vm0, %v2160_v6 }
 0x2d0   : > { %1957 = vmatprep.subr.mxu0 %v2160_v6 }
 0x2d2   : > { %1950 = vmatmul.mubr.msk.f32.vlgmr.msra.gmra.mrb[10].mxu0 %vm276_vm2, %v1297_v38 }
 0x2d3   : > { %1958 = vmatpush3.xpose.msk.msra.mxu0 %vm276_vm2, %v1470_v41  ;;  %1959 = vmatprep.mubr.msk.f32.mxu0 %vm2159_vm0, %v2160_v6 }
 0x2d4   : > { %1984 = vmatprep.subr.bf16.mxu0 %v2158_v3 }
 0x2d5   : > { %v2357_v42 = vpop.eup %2062 }
 0x2d6   : > { %1895 = vmatmul.mubr.msk.f32.vlgmr.msra.gmra.mrb[2].mxu1 %vm352_vm3, %v2357_v42  ;;  %1960 = vmatmul.mubr.msk.f32.vlgmr.msra.gmra.mrb[12].mxu0 %vm276_vm2, %v1468_v43 }
 0x2d7   : > { %1898 = vmatpush3.xpose.msk.msra.mxu1 %vm276_vm2, %v2307_v14  ;;  %1899 = vmatprep.mubr.msk.f32.mxu1 %vm2159_vm0, %v2160_v6 }
 0x2d8   : > { %1902 = vmatprep.subr.mxu1 %v2160_v6  ;;  %1975 = vmatprep.mubr.msk.f32.mxu0 %vm2159_vm0, %v2160_v6 }
 0x2da   : > { %1900 = vmatmul.mubr.msk.f32.vlgmr.msra.gmra.mrb[4].mxu1 %vm276_vm2, %v2313_v15 }
 0x2db   : > { %1903 = vmatpush3.msra.mxu1 %v530_v44  ;;  %1904 = vmatprep.mubr.msk.f32.mxu1 %vm2159_vm0, %v2160_v6 }
 0x2dc   : > { %1912 = vmatprep.subr.mxu1 %v2160_v6 }
 0x2ff   : > { %v692_v59 = vpop.xlane.xlu0 %691 }
 0x300   : > { %v693_v61 = vsub.f32 %v2331_v25, %v692_v59 }
 0x302   : > { %v694_v62 = vmul.f32 1.442695, %v693_v61 }
 0x303   : > { %v863_v60 = vpop.xlane.xlu0 %862 }
 0x304   : > { %v864_v63 = vsub.f32 %v2333_v27, %v863_v60  ;;  %2064 = vpow2.f32 %v694_v62  ;;  %v359_v27 = vsel %vm352_vm3, %v2357_v42, 0.0 }
 0x306   : > { %v865_v1 = vmul.f32 1.442695, %v864_v63 }
 0x307   : > { %v1034_v0 = vpop.xlane.xlu0 %1033 }
 0x308   : > { %v1035_v2 = vsub.f32 %v2337_v29, %v1034_v0  ;;  %2066 = vpow2.f32 %v865_v1  ;;  %v1639_v0 = vld [vmem:[%s2489_s2] sm:$0xff]  ;;  %v1640_v1 = vld [vmem:[%s2489_s2 + $0x8] sm:$0xff] }
 0x30a   : > { %v1036_v4 = vmul.f32 1.442695, %v1035_v2  ;;  %v1985_v2 = vpack.c.bf16 %v1640_v1, %v1639_v0 }
 0x30c   : > { %2068 = vpow2.f32 %v1036_v4  ;;  %v1641_v4 = vld [vmem:[%s2489_s2 + $0x10] sm:$0xff]  ;;  %1986 = vmatpush3.bf16.msra.mxu0 %v1985_v2 }
 0x30d   : > { %1987 = vmatprep.subr.bf16.mxu0 %v2158_v3 }
 0x30e   : > { %v2065_v5 = vpop.eup %2064 }
 0x30f   : > { %v696_v7 = vsel %vm352_vm3, %v2065_v5, 0.0 }
 0x312   : > { %v2067_v8 = vpop.eup %2066 }
 0x316   : > { %v2069_v10 = vpop.eup %2068 }
 0x317   : > { %v1038_v11 = vsel %vm352_vm3, %v2069_v10, 0.0 }
 0x3a1   : > { %v1199_v45 = vpop.f32.mrb[8].mxu0 }
 0x3a2   : > { %v1941_v46 = vpop.f32.mrb[9].mxu0  ;;  %v1203_v47 = vsel %vm352_vm3, %v1199_v45, -inf }
 0x3a3   : > { %1204 = vmax.xlane.f32.xlu1 %v1203_v47 }
 0x3a5   : > { %v1370_v48 = vpop.f32.mrb[10].mxu0 }
 0x3a6   : > { %v1951_v49 = vpop.f32.mrb[11].mxu0  ;;  %v1374_v50 = vsel %vm352_vm3, %v1370_v48, -inf }
 0x3a7   : > { %1375 = vmax.xlane.f32.xlu0 %v1374_v50 }
 0x3a9   : > { %v2376_v51 = vpop.f32.mrb[2].mxu1  ;;  %v1541_v52 = vpop.f32.mrb[12].mxu0 }
 0x3aa   : > { %v1896_v53 = vpop.f32.mrb[3].mxu1  ;;  %v1961_v54 = vpop.f32.mrb[13].mxu0  ;;  %v1545_v55 = vsel %vm352_vm3, %v1541_v52, -inf }
 0x3ab   : > { %1546 = vmax.xlane.f32.xlu1 %v1545_v55 }
 0x3ad   : > { %v515_v56 = vpop.f32.mrb[4].mxu1 }
 0x3ae   : > { %v1901_v57 = vpop.f32.mrb[5].mxu1  ;;  %v519_v58 = vsel %vm352_vm3, %v515_v56, -inf }
 0x3af   : > { %520 = vmax.xlane.f32.xlu1 %v519_v58 }
 0x3bd   : > { %1213 = vrot.lane.b32.xlu0 %v2293_v9, %s2179_s20  ;;  %s2188_s20 = smov 20  }
 0x3c0   : > { %871 = vrot.lane.b32.xlu1 %v2293_v9, %s2180_s22  ;;  %s2189_s22 = smov 24  }
 0x3c1   : > { %1555 = vrot.lane.b32.xlu0 %v2293_v9, %s2181_s23  ;;  %s2190_s23 = smov 28  }
 0x3c4   : > { %1042 = vrot.lane.b32.xlu1 %v2293_v9, %s2182_s27  ;;  %s186_s27 = sand.u32 1, %s2148_s16  }
 0x3c5   : > { %s1725_s11 = scalar_lea.sflag [#allocation4], %s186_s27 }
 0x3c8   : > { %1384 = vrot.lane.b32.xlu1 %v2293_v9, %s2183_s28  ;;  %v867_v9 = vsel %vm352_vm3, %v2067_v8, 0.0  ;;  %s1801_s28 = sshll.u32 %s186_s27, 3 }
 0x3c9   : > { %s188_s6 = scalar_lea.vmem [#allocation3], %s1801_s28 }
 0x3ca   : > { %s1738_s7 = sshll.u32 %s188_s6, 4  ;;  %s2447_s7 = int_to_ptr.vmem [resolvable:$true] %s1738_s7 }
 0x3cb   : > { %s2094_s12 = scalar_lea.vmem %s2447_s7, 128 }
 0x3cc   : > { %p2095_p11 = scmp.ne.s32.totalorder %s2447_s7, %s2094_s12 }
 0x3ce   : > { %p2096_p12 = pnand %p2095_p11, %p2255_p5 }
 0x3d0   : > { %p2097_p13 = pneg %p2096_p12 }
 0x3e0   : > { %697 = vadd.xlane.f32.xlu0 %v696_v7 }
 0x3e4   : > { %868 = vadd.xlane.f32.xlu0 %v867_v9 }
 0x3e8   : > { %1039 = vadd.xlane.f32.xlu0 %v1038_v11 }
 0x430   : > { %v1205_v13 = vpop.xlane.xlu1 %1204 }
 0x431   : > { %v1206_v18 = vsub.f32 %v1199_v45, %v1205_v13 }
 0x433   : > { %v1207_v21 = vmul.f32 1.442695, %v1206_v18 }
 0x434   : > { %v1376_v14 = vpop.xlane.xlu0 %1375 }
 0x435   : > { %v1377_v15 = vsub.f32 %v1370_v48, %v1376_v14 }
 0x437   : > { %v1378_v16 = vmul.f32 1.442695, %v1377_v15 }
 0x438   : > { %v1547_v17 = vpop.xlane.xlu1 %1546  ;;  %v1214_v36 = vpop.permute.xlu0 %1213 }
 0x439   : > { %2070 = vpow2.f32 %v1378_v16  ;;  %v1548_v22 = vsub.f32 %v1541_v52, %v1547_v17 }
 0x43b   : > { %v1549_v25 = vmul.f32 1.442695, %v1548_v22 }
 0x43c   : > { %v521_v19 = vpop.xlane.xlu1 %520  ;;  %v1556_v38 = vpop.permute.xlu0 %1555 }
 0x43d   : > { %v522_v20 = vsub.f32 %v515_v56, %v521_v19 }
 0x43f   : > { %v523_v23 = vmul.f32 1.442695, %v522_v20 }
 0x440   : > { %v872_v31 = vpop.permute.xlu1 %871 }
 0x441   : > { %2072 = vpow2.f32 %v523_v23 }
 0x442   : > { %2074 = vpow2.f32 %v1207_v21 }
 0x443   : > { %v2071_v24 = vpop.eup %2070  ;;  %2076 = vpow2.f32 %v1549_v25 }
 0x444   : > { %v1380_v26 = vsel %vm352_vm3, %v2071_v24, 0.0  ;;  %v1043_v34 = vpop.permute.xlu1 %1042 }
 0x445   : > { %1381 = vadd.xlane.f32.xlu0 %v1380_v26 }
 0x448   : > { %v1385_v37 = vpop.permute.xlu1 %1384 }
 0x449   : > { %360 = vadd.xlane.f32.xlu0 %v359_v27  ;;  %v1828_v27 = vld [vmem:[%s2490_s3] ss:$0 sm:$0xff] }
 0x44b   : > { %v2073_v28 = vpop.eup %2072 }
 0x44c   : > { %1905 = vmatmul.mubr.msk.f32.vlgmr.msra.gmra.mrb[6].mxu1 %vm352_vm3, %v2073_v28  ;;  %v525_v29 = vsel %vm352_vm3, %v2073_v28, 0.0  ;;  %v2075_v30 = vpop.eup %2074 }
 0x44d   : > { %1913 = vmatpush3.msra.mxu1 %v701_v12  ;;  %526 = vadd.xlane.f32.xlu1 %v525_v29  ;;  %v1209_v32 = vsel %vm352_vm3, %v2075_v30, 0.0  ;;  %v2077_v33 = vpop.eup %2076 }
 0x44e   : > { %1914 = vmatprep.mubr.msk.f32.mxu1 %vm2159_vm0, %v2160_v6  ;;  %1922 = vmatprep.subr.mxu1 %v2160_v6  ;;  %v1551_v35 = vsel %vm352_vm3, %v2077_v33, 0.0 }
 0x450   : > { %1915 = vmatmul.mubr.msk.f32.vlgmr.msra.gmra.mrb[8].mxu1 %vm352_vm3, %v2065_v5  ;;  %v1642_v5 = vld [vmem:[%s2489_s2 + $0x18] sm:$0xff] }
 0x451   : > { %1923 = vmatpush3.msra.mxu1 %v872_v31  ;;  %1210 = vadd.xlane.f32.xlu1 %v1209_v32  ;;  %v1988_v9 = vpack.c.bf16 %v1642_v5, %v1641_v4 }
 0x452   : > { %1924 = vmatprep.mubr.msk.f32.mxu1 %vm2159_vm0, %v2160_v6  ;;  %1932 = vmatprep.subr.mxu1 %v2160_v6 }
 0x453   : > { %1989 = vmatpush3.bf16.msra.mxu0 %v1988_v9 }
 0x454   : > { %1925 = vmatmul.mubr.msk.f32.vlgmr.msra.gmra.mrb[10].mxu1 %vm352_vm3, %v2067_v8 }
 0x455   : > { %1933 = vmatpush3.msra.mxu1 %v1043_v34  ;;  %1552 = vadd.xlane.f32.xlu1 %v1551_v35 }
 0x456   : > { %1934 = vmatprep.mubr.msk.f32.mxu1 %vm2159_vm0, %v2160_v6  ;;  %1942 = vmatprep.subr.mxu1 %v2160_v6 }
 0x458   : > { %1935 = vmatmul.mubr.msk.f32.vlgmr.msra.gmra.mrb[12].mxu1 %vm352_vm3, %v2069_v10 }
 0x459   : > { %1943 = vmatpush3.msra.mxu1 %v1214_v36  ;;  %1944 = vmatprep.mubr.msk.f32.mxu1 %vm2159_vm0, %v2160_v6 }
 0x45a   : > { %1952 = vmatprep.subr.mxu1 %v2160_v6 }
 0x45c   : > { %1945 = vmatmul.mubr.msk.f32.vlgmr.msra.gmra.mrb[14].mxu1 %vm352_vm3, %v2075_v30 }
 0x45d   : > { %1953 = vmatpush3.msra.mxu1 %v1385_v37  ;;  %1954 = vmatprep.mubr.msk.f32.mxu1 %vm2159_vm0, %v2160_v6 }
 0x45e   : > { %1962 = vmatprep.subr.mxu1 %v2160_v6 }
 0x460   : > { %1955 = vmatmul.mubr.msk.f32.vlgmr.msra.gmra.mrb[16].mxu1 %vm352_vm3, %v2071_v24 }
 0x461   : > { %1963 = vmatpush3.msra.mxu1 %v1556_v38  ;;  %1964 = vmatprep.mubr.msk.f32.mxu1 %vm2159_vm0, %v2160_v6 }
 0x464   : > { %1965 = vmatmul.mubr.msk.f32.vlgmr.msra.gmra.mrb[18].mxu1 %vm352_vm3, %v2077_v33 }
 0x46d   : > { %v698_v39 = vpop.xlane.xlu0 %697 }
 0x471   : > { %v869_v40 = vpop.xlane.xlu0 %868 }
 0x475   : > { %v1040_v41 = vpop.xlane.xlu0 %1039 }
 0x4d2   : > { %v1382_v42 = vpop.xlane.xlu0 %1381 }
 0x4d6   : > { %v361_v43 = vpop.xlane.xlu0 %360 }
 0x4d7   : > { %2078 = vrcp.f32 %v361_v43 }
 0x4da   : > { %v527_v46 = vpop.xlane.xlu1 %526 }
 0x4db   : > { %2080 = vrcp.f32 %v527_v46 }
 0x4dc   : > { %2082 = vrcp.f32 %v698_v39 }
 0x4dd   : > { %2084 = vrcp.f32 %v869_v40 }
 0x4de   : > { %2086 = vrcp.f32 %v1040_v41  ;;  %v1211_v50 = vpop.xlane.xlu1 %1210 }
 0x4df   : > { %2088 = vrcp.f32 %v1211_v50 }
 0x4e0   : > { %2090 = vrcp.f32 %v1382_v42 }
 0x4e1   : > { %v2079_v44 = vpop.eup %2078 }
 0x4e2   : > { %v439_v45 = vmul.f32 %v2079_v44, %v2376_v51  ;;  %v1553_v59 = vpop.xlane.xlu1 %1552 }
 0x4e3   : > { %2092 = vrcp.f32 %v1553_v59 }
 0x4e4   : > { %440 = vst.msk [vmem:[#allocation2] sm:$0xff] %vm276_vm2, %v439_v45 }
 0x4e5   : > { %v2081_v47 = vpop.eup %2080 }
 0x4e6   : > { %v2083_v52 = vpop.eup %2082 }
 0x4e7   : > { %v2085_v51 = vpop.eup %2084 }
 0x4e8   : > { %v2087_v60 = vpop.eup %2086 }
 0x4e9   : > { %v2089_v7 = vpop.eup %2088 }
 0x4ea   : > { %v2091_v12 = vpop.eup %2090 }
 0x4ed   : > { %v2093_v16 = vpop.eup %2092 }
 0x51f   : > { %v601_v48 = vpop.f32.mrb[6].mxu1 }
 0x520   : > { %v605_v6 = vmul.f32 %v2081_v47, %v601_v48  ;;  %v1906_v49 = vpop.f32.mrb[7].mxu1 }
 0x522   : > { %607 = vrot.lane.b32.xlu1 %v605_v6, %s2184_s29 }
 0x523   : > { %v772_v53 = vpop.f32.mrb[8].mxu1 }
 0x524   : > { %v776_v54 = vmul.f32 %v2083_v52, %v772_v53  ;;  %v1916_v55 = vpop.f32.mrb[9].mxu1 }
 0x526   : > { %778 = vrot.lane.b32.xlu0 %v776_v54, %s2185_s30 }
 0x527   : > { %v943_v56 = vpop.f32.mrb[10].mxu1 }
 0x528   : > { %v947_v57 = vmul.f32 %v2085_v51, %v943_v56  ;;  %v1926_v58 = vpop.f32.mrb[11].mxu1 }
 0x52a   : > { %949 = vrot.lane.b32.xlu1 %v947_v57, %s2186_s5  ;;  %s1831_s5 = sshll.u32 %s2238_s19, 7  ;;  %s2191_s19 = smov [#allocation3]  }
 0x52b   : > { %v1114_v61 = vpop.f32.mrb[12].mxu1  ;;  %s2445_s10 = scalar_lea.hbm %s2491_s4, %s1831_s5  ;;  %s2098_s13 = sshll.u32 %s2191_s19, 4  ;;  %s2099_s13 = int_to_ptr.vmem [resolvable:$false] %s2098_s13 }
 0x52c   : > { %v1118_v62 = vmul.f32 %v2087_v60, %v1114_v61  ;;  %v1936_v63 = vpop.f32.mrb[13].mxu1  ;;  %p2101_p0 = scmp.lt.s32.totalorder %s2447_s7, %s2099_s13 }
 0x52e   : > { %1120 = vrot.lane.b32.xlu1 %v1118_v62, %s2187_s14  ;;  %s2100_s14 = scalar_lea.vmem %s2099_s13, 256 }
 0x52f   : > { %v1285_v8 = vpop.f32.mrb[14].mxu1  ;;  %p2102_p1 = scmp.lt.s32.totalorder %s2100_s14, %s2094_s12 }
 0x530   : > { %v1289_v10 = vmul.f32 %v2089_v7, %v1285_v8  ;;  %v1946_v11 = vpop.f32.mrb[15].mxu1 }
 0x531   : > { %p2103_p2 = por %p2102_p1, %p2101_p0 }
 0x532   : > { %1291 = vrot.lane.b32.xlu1 %v1289_v10, %s2188_s20 }
 0x533   : > { %v1456_v13 = vpop.f32.mrb[16].mxu1  ;;  %p2104_p3 = pnand %p2103_p2, %p2097_p13 }
 0x534   : > { %v1460_v14 = vmul.f32 %v2091_v12, %v1456_v13  ;;  %v1956_v15 = vpop.f32.mrb[17].mxu1 }
 0x536   : > { %1462 = vrot.lane.b32.xlu0 %v1460_v14, %s2189_s22 }
 0x537   : > { %v1627_v17 = vpop.f32.mrb[18].mxu1 }
 0x538   : > { %v1631_v18 = vmul.f32 %v2093_v16, %v1627_v17  ;;  %v1966_v19 = vpop.f32.mrb[19].mxu1 }
 0x53a   : > { %1633 = vrot.lane.b32.xlu1 %v1631_v18, %s2190_s23 }
 0x594   : > { %v608_v20 = vpop.permute.xlu1 %607 }
 0x595   : > { %611 = vst.msk [vmem:[#allocation2] sm:$0xff] %vm610_vm4, %v608_v20 }
 0x598   : > { %v779_v3 = vpop.permute.xlu0 %778 }
 0x599   : > { %782 = vst.msk [vmem:[#allocation2] sm:$0xff] %vm781_vm5, %v779_v3 }
 0x59c   : > { %v950_v21 = vpop.permute.xlu1 %949 }
 0x59d   : > { %953 = vst.msk [vmem:[#allocation2] sm:$0xff] %vm952_vm6, %v950_v21 }
 0x5a0   : > { %v1121_v22 = vpop.permute.xlu1 %1120 }
 0x5a1   : > { %1124 = vst.msk [vmem:[#allocation2] sm:$0xff] %vm1123_vm7, %v1121_v22 }
 0x5a4   : > { %v1292_v23 = vpop.permute.xlu1 %1291 }
 0x5a5   : > { %1295 = vst.msk [vmem:[#allocation2] sm:$0xff] %vm1294_vm8, %v1292_v23 }
 0x5a8   : > { %v1463_v24 = vpop.permute.xlu0 %1462 }
 0x5a9   : > { %1466 = vst.msk [vmem:[#allocation2] sm:$0xff] %vm1465_vm9, %v1463_v24 }
 0x5ac   : > { %v1634_v25 = vpop.permute.xlu1 %1633 }
 0x5ad   : > { %1637 = vst.msk [vmem:[#allocation2] sm:$0xff] %vm1636_vm10, %v1634_v25 }
 0x5b4   : > { %v1638_v26 = vld [vmem:[#allocation2] sm:$0xff] }
 0x5b5   : > { %1976 = vmatmul.mubr.msk.f32.vlgmr.msra.gmra.mrb[14].mxu0 %vm198_vm1, %v1638_v26 }
 0x688   : > { %v1719_v28 = vpop.f32.mrb[14].mxu0 }
 0x689   : > { %v1720_v29 = vadd.f32 %v1828_v27, %v1719_v28  ;;  %v1977_v30 = vpop.f32.mrb[15].mxu0 }
 0x68b   : > { %1723 = vst [vmem:[%s188_s6] sm:$0xff] %v1720_v29 }
 0x68c   : > { %2107 = shalt.err (!%p2104_p3)
}
 0x68d   : > { %s2108_s20 = scalar_lea.hbm %s2445_s10, 128  ;;  %s2112_s27 = scalar_lea.hbm %s2491_s4, 256 }
 0x68e   : > { %p2109_p4 = scmp.ne.s32.totalorder %s2445_s10, %s2108_s20  ;;  %p2113_p9 = scmp.lt.u32.totalorder %s2445_s10, %s2491_s4 }
 0x68f   : > { %p2114_p10 = scmp.lt.u32.totalorder %s2112_s27, %s2108_s20  ;;  %p2116_p12 = scmp.lt.u32.totalorder %s2108_s20, %s2445_s10 }
 0x690   : > { %p2110_p7 = pnand %p2109_p4, %p2255_p5 }
 0x691   : > { %p2115_p11 = por %p2114_p10, %p2113_p9 }
 0x692   : > { %p2111_p8 = pneg %p2110_p7 }
 0x693   : > { %p2117_p13 = por %p2116_p12, %p2115_p11 }
 0x695   : > { %p2118_p0 = pnand %p2117_p13, %p2111_p8 }
 0x697   : > { %2121 = shalt.err (!%p2118_p0)
}
 0x698   : > { %1990 = dma.vmem_to_hbm [thread:$0]  (%p2255_p5), %s2447_s7, 128, %s2445_s10, %s1725_s11  }
 0x699 PF: > { %p1996_p1 = scmp.ge.s32.totalorder %s2156_s18, 2  ;;  %s1750_s30 = sand.u32 1, %s2144_s15  }
 0x69a   : > { %s1751_s5 = scalar_lea.sflag [#allocation4], %s1750_s30 }
 0x69b   : > { %p1993_p2 = pnand %p1996_p1, %p2259_p6 }
 0x69d   : > { %2139 = dma.done.wait (!%p1993_p2), %s1751_s5, 128  }
 0x69e   : > { %2141 = vsyncadd (!%p1993_p2), %s1751_s5, 4294967168  ;;  %p14_p3 = scmp.ge.s32.totalorder %s2242_s21, 4   ;;  %s2494_s15 = smov %s2148_s16 }
 0x69f   : > { %s2495_s16 = smov %s2152_s17  ;;  %s2496_s17 = smov %s2253_s24 }
 0x6a0   : > { %s2497_s18 = smov %s2242_s21  ;;  %16 = sbr.rel (!%p14_p3) target bundleno = 3 (0x3), region = 71 }
 0x6a7   :  { %1756 = vsyncpa [#allocation4], 1 }
 0x6a8   :  { %1758 = vsyncpa [#allocation4 + $0x1], 1 }

</bundles_post_ra>
